<compile_context>
chip_gen: v7x
topology: tpu7x:2x2x1
jax: 0.10.0
libtpu: 0.0.40
codegen_flags: <defaults>
</compile_context>

<pallas_src>
import jax
import jax.numpy as jnp
from jax.experimental import pallas as pl
from jax.experimental.pallas import tpu as pltpu

# Architecture constants fixed by the module (hidden widths) and lane padding.
_H1 = 256          # encoder/decoder wide hidden
_H2 = 128          # encoder/decoder narrow hidden
_LPAD = 128        # latent dim padded to one vreg of lanes
_OPAD = 128        # 3 * n_gaussians padded to one vreg of lanes
_OUT_W = _OPAD + 2 * _LPAD   # packed output slab width: [recon | mu | logvar]

# Offsets inside the packed bias array (all multiples of 128 lanes).
_B1, _B2, _B3M, _B3V, _B4, _B5, _B6 = 0, 256, 384, 512, 640, 768, 1024
_BTOT = 1152


def _round_up(n, m):
    return ((n + m - 1) // m) * m


def _pad2(a, rows, cols):
    return jnp.pad(a, ((0, rows - a.shape[0]), (0, cols - a.shape[1])))


# --------------------------------------------------------------------------
# Kernel
# --------------------------------------------------------------------------
def mixture_vae_kernel(x_ref, eps_ref, w_in_ref, w_h128_ref, w_h256_ref,
                       b_ref, out_ref):
    f32 = jnp.float32
    dt = w_in_ref.dtype  # weight/compute dtype for the MXU (f32 or bf16)

    # Packed weights: static slices at 128-lane boundaries (no relayout).
    w1 = w_in_ref[...]                  # (IN_PAD, 256)
    w3m = w_h128_ref[:, 0:128]          # (128, 128)  -> mu
    w3v = w_h128_ref[:, 128:256]        # (128, 128)  -> log_var
    w4 = w_h128_ref[:, 256:384]         # (128, 128)  decoder L1
    w5 = w_h128_ref[:, 384:640]         # (128, 256)  decoder L2
    w2 = w_h256_ref[:, 0:128]           # (256, 128)  encoder L2
    w6 = w_h256_ref[:, 128:256]         # (256, 128)  decoder L3 (padded cols)

    b1 = b_ref[:, _B1:_B2]
    b2 = b_ref[:, _B2:_B3M]
    b3m = b_ref[:, _B3M:_B3V]
    b3v = b_ref[:, _B3V:_B4]
    b4 = b_ref[:, _B4:_B5]
    b5 = b_ref[:, _B5:_B6]
    b6 = b_ref[:, _B6:_BTOT]

    x = x_ref[...].astype(dt)

    # ---- encoder: Linear -> ReLU -> Linear -> ReLU -> {Linear_mu, Linear_logvar}
    h = jnp.dot(x, w1, preferred_element_type=f32) + b1
    h = jnp.maximum(h, 0.0)
    h = jnp.dot(h.astype(dt), w2, preferred_element_type=f32) + b2
    h = jnp.maximum(h, 0.0)
    mu = jnp.dot(h.astype(dt), w3m, preferred_element_type=f32) + b3m       # (TB,128), pad lanes = 0
    log_var = jnp.dot(h.astype(dt), w3v, preferred_element_type=f32) + b3v  # (TB,128), pad lanes = 0

    # ---- reparameterize: z = mu + eps * exp(0.5 * log_var)   (f32 elementwise)
    z = mu + eps_ref[...] * jnp.exp(0.5 * log_var)

    # ---- decoder: Linear -> ReLU -> Linear -> ReLU -> Linear
    d = jnp.dot(z.astype(dt), w4, preferred_element_type=f32) + b4
    d = jnp.maximum(d, 0.0)
    d = jnp.dot(d.astype(dt), w5, preferred_element_type=f32) + b5
    d = jnp.maximum(d, 0.0)
    recon = jnp.dot(d.astype(dt), w6, preferred_element_type=f32) + b6      # (TB,128), pad lanes = 0

    # One lane-dense (multiple-of-128) store: [recon | mu | log_var]
    out_ref[...] = jnp.concatenate([recon, mu, log_var], axis=-1)


# --------------------------------------------------------------------------
# Parameter init / packing
# --------------------------------------------------------------------------
def init_raw_params(key, input_dim, latent_dim, n_gaussians):
    """Seeded init; weights stored (in_features, out_features), biases 1-D."""
    dims = [
        (input_dim, _H1), (_H1, _H2), (_H2, latent_dim * 2),        # encoder
        (latent_dim, _H2), (_H2, _H1), (_H1, n_gaussians * 3),      # decoder
    ]
    params = []
    for i, (fin, fout) in enumerate(dims):
        kw, kb = jax.random.split(jax.random.fold_in(key, i))
        scale = 1.0 / (fin ** 0.5)  # torch Linear default-ish scale
        w = jax.random.uniform(kw, (fin, fout), jnp.float32, -scale, scale)
        b = jax.random.uniform(kb, (fout,), jnp.float32, -scale, scale)
        params.append((w, b))
    return params


def pack_params(raw_params, input_dim, latent_dim, n_gaussians,
                weight_dtype=jnp.float32):
    """Pad thin dims to 128 lanes and pack into 3 weight arrays + 1 bias array."""
    assert latent_dim <= 128 and 3 * n_gaussians <= 128, \
        "packing assumes latent_dim and 3*n_gaussians fit in one 128-lane vreg"
    (w1, b1), (w2, b2), (w3, b3), (w4, b4), (w5, b5), (w6, b6) = raw_params
    L = latent_dim
    in_pad = _round_up(input_dim, 128)

    w3_mu, w3_lv = w3[:, :L], w3[:, L:2 * L]
    b3_mu, b3_lv = b3[:L], b3[L:2 * L]

    w_in = _pad2(w1, in_pad, _H1).astype(weight_dtype)                     # (IN_PAD, 256)
    w_h128 = jnp.concatenate([                                             # (128, 640)
        _pad2(w3_mu, _H2, _LPAD),
        _pad2(w3_lv, _H2, _LPAD),
        _pad2(w4, _LPAD, _H2),
        w5,
    ], axis=1).astype(weight_dtype)
    w_h256 = jnp.concatenate([w2, _pad2(w6, _H1, _OPAD)],                  # (256, 256)
                             axis=1).astype(weight_dtype)
    b_all = jnp.concatenate([                                              # (1, 1152), keep f32
        b1, b2,
        jnp.pad(b3_mu, (0, _LPAD - L)), jnp.pad(b3_lv, (0, _LPAD - L)),
        b4, b5, jnp.pad(b6, (0, _OPAD - 3 * n_gaussians)),
    ]).reshape(1, _BTOT).astype(jnp.float32)
    return w_in, w_h128, w_h256, b_all


# --------------------------------------------------------------------------
# Wrapper
# --------------------------------------------------------------------------
def mixture_vae_forward(x, eps, packed_params, *, latent_dim, n_gaussians,
                        tile_batch=256):
    w_in, w_h128, w_h256, b_all = packed_params
    batch, input_dim = x.shape
    in_pad = w_in.shape[0]

    tb = min(tile_batch, _round_up(batch, 8))
    b_pad = _round_up(batch, tb)

    # Zero-pad batch + thin lane dims (zeros are inert through the padded weights).
    x_p = jnp.zeros((b_pad, in_pad), jnp.float32).at[:batch, :input_dim].set(x)
    eps_p = jnp.zeros((b_pad, _LPAD), jnp.float32).at[:batch, :latent_dim].set(eps)

    flops = 2 * b_pad * (in_pad * _H1 + _H1 * _H2 + 2 * _H2 * _LPAD
                         + _LPAD * _H2 + _H2 * _H1 + _H1 * _OPAD)
    wbytes = sum(int(a.size) * a.dtype.itemsize
                 for a in (w_in, w_h128, w_h256, b_all))
    cost = pl.CostEstimate(
        flops=int(flops),
        transcendentals=int(b_pad * _LPAD),
        bytes_accessed=int(4 * (x_p.size + eps_p.size + b_pad * _OUT_W) + wbytes),
    )

    out = pl.pallas_call(
        mixture_vae_kernel,
        out_shape=jax.ShapeDtypeStruct((b_pad, _OUT_W), jnp.float32),
        grid=(b_pad // tb,),
        in_specs=[
            pl.BlockSpec((tb, in_pad), lambda i: (i, 0)),     # x tile
            pl.BlockSpec((tb, _LPAD), lambda i: (i, 0)),      # eps tile
            pl.BlockSpec(w_in.shape, lambda i: (0, 0)),       # weights: VMEM-resident
            pl.BlockSpec(w_h128.shape, lambda i: (0, 0)),
            pl.BlockSpec(w_h256.shape, lambda i: (0, 0)),
            pl.BlockSpec(b_all.shape, lambda i: (0, 0)),
        ],
        out_specs=pl.BlockSpec((tb, _OUT_W), lambda i: (i, 0)),
        compiler_params=pltpu.CompilerParams(
            dimension_semantics=("parallel",),
            vmem_limit_bytes=32 * 1024 * 1024,
        ),
        cost_estimate=cost,
    )(x_p, eps_p, w_in, w_h128, w_h256, b_all)

    recon = out[:batch, :3 * n_gaussians].reshape(batch, n_gaussians, 3)
    mu = out[:batch, _OPAD:_OPAD + latent_dim]
    log_var = out[:batch, _OPAD + _LPAD:_OPAD + _LPAD + latent_dim]
    return recon, mu, log_var


# --------------------------------------------------------------------------
# Pure-JAX reference (matches the PyTorch module)
# --------------------------------------------------------------------------
def mixture_vae_reference(x, eps, raw_params, latent_dim, n_gaussians):
    hi = jax.lax.Precision.HIGHEST
    (w1, b1), (w2, b2), (w3, b3), (w4, b4), (w5, b5), (w6, b6) = raw_params
    h = jnp.maximum(jnp.dot(x, w1, precision=hi) + b1, 0.0)
    h = jnp.maximum(jnp.dot(h, w2, precision=hi) + b2, 0.0)
    h = jnp.dot(h, w3, precision=hi) + b3
    mu, log_var = h[:, :latent_dim], h[:, latent_dim:2 * latent_dim]
    z = mu + eps * jnp.exp(0.5 * log_var)
    d = jnp.maximum(jnp.dot(z, w4, precision=hi) + b4, 0.0)
    d = jnp.maximum(jnp.dot(d, w5, precision=hi) + b5, 0.0)
    r = jnp.dot(d, w6, precision=hi) + b6
    return r.reshape(-1, n_gaussians, 3), mu, log_var


if __name__ == "__main__":
    input_dim, latent_dim, n_gaussians, batch = 64, 8, 4, 8

    key = jax.random.PRNGKey(0)
    k_x, k_eps, k_params = jax.random.split(key, 3)

    x = jax.random.normal(k_x, (batch, input_dim), jnp.float32)
    eps = jax.random.normal(k_eps, (batch, latent_dim), jnp.float32)
    raw = init_raw_params(k_params, input_dim, latent_dim, n_gaussians)

    ref = mixture_vae_reference(x, eps, raw, latent_dim, n_gaussians)

    # f32 weights (exact-parity path, v5e-friendly elementwise is always f32)
    packed_f32 = pack_params(raw, input_dim, latent_dim, n_gaussians, jnp.float32)
    out_f32 = jax.block_until_ready(
        mixture_vae_forward(x, eps, packed_f32,
                            latent_dim=latent_dim, n_gaussians=n_gaussians))
    assert out_f32[0].shape == (batch, n_gaussians, 3)
    assert out_f32[1].shape == (batch, latent_dim)
    assert out_f32[2].shape == (batch, latent_dim)
    for got, want in zip(out_f32, ref):
        assert jnp.allclose(got, want, atol=5e-2, rtol=5e-2)

    # bf16 weights (v6e/v7x MXU-native path; f32 accumulation + f32 elementwise)
    packed_bf16 = pack_params(raw, input_dim, latent_dim, n_gaussians, jnp.bfloat16)
    out_bf16 = jax.block_until_ready(
        mixture_vae_forward(x, eps, packed_bf16,
                            latent_dim=latent_dim, n_gaussians=n_gaussians))
    for got, want in zip(out_bf16, ref):
        assert got.shape == want.shape
        assert jnp.allclose(got, want, atol=1e-1, rtol=1e-1)

    print("KERNEL_OK")
</pallas_src>

<mosaic_0001>
module attributes {stable_mosaic.version = 11 : i64} {
  func.func @mixture_vae_kernel(%arg0: i32, %arg1: memref<8x128xf32, #tpu.memory_space<vmem>>, %arg2: memref<8x128xf32, #tpu.memory_space<vmem>>, %arg3: memref<128x256xf32, #tpu.memory_space<vmem>>, %arg4: memref<128x640xf32, #tpu.memory_space<vmem>>, %arg5: memref<256x256xf32, #tpu.memory_space<vmem>>, %arg6: memref<1x1152xf32, #tpu.memory_space<vmem>>, %arg7: memref<8x384xf32, #tpu.memory_space<vmem>>) attributes {dimension_semantics = [#tpu.dimension_semantics<parallel>], iteration_bounds = array<i64: 1>, scalar_prefetch = 0 : i64, scratch_operands = 0 : i64, tpu.core_type = #tpu.core_type<tc>, window_params = [{transform_indices = @transform_0, window_bounds = array<i64: 8, 128>}, {transform_indices = @transform_1, window_bounds = array<i64: 8, 128>}, {pipeline_mode = #tpu.pipeline_mode<synchronous>, transform_indices = @transform_2, window_bounds = array<i64: 128, 256>}, {pipeline_mode = #tpu.pipeline_mode<synchronous>, transform_indices = @transform_3, window_bounds = array<i64: 128, 640>}, {pipeline_mode = #tpu.pipeline_mode<synchronous>, transform_indices = @transform_4, window_bounds = array<i64: 256, 256>}, {pipeline_mode = #tpu.pipeline_mode<synchronous>, transform_indices = @transform_5, window_bounds = array<i64: 1, 1152>}, {transform_indices = @transform_6, window_bounds = array<i64: 8, 384>}]} {
    %c0 = arith.constant 0 : index
    %c0_0 = arith.constant 0 : index
    %0 = vector.load %arg3[%c0, %c0_0] : memref<128x256xf32, #tpu.memory_space<vmem>>, vector<128x256xf32>
    %c0_1 = arith.constant 0 : index
    %c0_2 = arith.constant 0 : index
    %1 = vector.load %arg4[%c0_1, %c0_2] : memref<128x640xf32, #tpu.memory_space<vmem>>, vector<128x128xf32>
    %c0_3 = arith.constant 0 : index
    %c128 = arith.constant 128 : index
    %2 = vector.load %arg4[%c0_3, %c128] : memref<128x640xf32, #tpu.memory_space<vmem>>, vector<128x128xf32>
    %c0_4 = arith.constant 0 : index
    %c256 = arith.constant 256 : index
    %3 = vector.load %arg4[%c0_4, %c256] : memref<128x640xf32, #tpu.memory_space<vmem>>, vector<128x128xf32>
    %c0_5 = arith.constant 0 : index
    %c384 = arith.constant 384 : index
    %4 = vector.load %arg4[%c0_5, %c384] : memref<128x640xf32, #tpu.memory_space<vmem>>, vector<128x256xf32>
    %c0_6 = arith.constant 0 : index
    %c0_7 = arith.constant 0 : index
    %5 = vector.load %arg5[%c0_6, %c0_7] : memref<256x256xf32, #tpu.memory_space<vmem>>, vector<256x128xf32>
    %c0_8 = arith.constant 0 : index
    %c128_9 = arith.constant 128 : index
    %6 = vector.load %arg5[%c0_8, %c128_9] : memref<256x256xf32, #tpu.memory_space<vmem>>, vector<256x128xf32>
    %c0_10 = arith.constant 0 : index
    %c0_11 = arith.constant 0 : index
    %7 = vector.load %arg6[%c0_10, %c0_11] : memref<1x1152xf32, #tpu.memory_space<vmem>>, vector<1x256xf32>
    %c0_12 = arith.constant 0 : index
    %c256_13 = arith.constant 256 : index
    %8 = vector.load %arg6[%c0_12, %c256_13] : memref<1x1152xf32, #tpu.memory_space<vmem>>, vector<1x128xf32>
    %c0_14 = arith.constant 0 : index
    %c384_15 = arith.constant 384 : index
    %9 = vector.load %arg6[%c0_14, %c384_15] : memref<1x1152xf32, #tpu.memory_space<vmem>>, vector<1x128xf32>
    %c0_16 = arith.constant 0 : index
    %c512 = arith.constant 512 : index
    %10 = vector.load %arg6[%c0_16, %c512] : memref<1x1152xf32, #tpu.memory_space<vmem>>, vector<1x128xf32>
    %c0_17 = arith.constant 0 : index
    %c640 = arith.constant 640 : index
    %11 = vector.load %arg6[%c0_17, %c640] : memref<1x1152xf32, #tpu.memory_space<vmem>>, vector<1x128xf32>
    %c0_18 = arith.constant 0 : index
    %c768 = arith.constant 768 : index
    %12 = vector.load %arg6[%c0_18, %c768] : memref<1x1152xf32, #tpu.memory_space<vmem>>, vector<1x256xf32>
    %c0_19 = arith.constant 0 : index
    %c1024 = arith.constant 1024 : index
    %13 = vector.load %arg6[%c0_19, %c1024] : memref<1x1152xf32, #tpu.memory_space<vmem>>, vector<1x128xf32>
    %c0_20 = arith.constant 0 : index
    %c0_21 = arith.constant 0 : index
    %14 = vector.load %arg1[%c0_20, %c0_21] : memref<8x128xf32, #tpu.memory_space<vmem>>, vector<8x128xf32>
    %cst = arith.constant dense<0.000000e+00> : vector<8x256xf32>
    %15 = tpu.matmul %14, %0, %cst {dimension_numbers = #tpu.dot_dimension_numbers<[1], [0], [0], [1], [0, 0, 1, 1], [], []>} : vector<8x128xf32>, vector<128x256xf32>, vector<8x256xf32> -> vector<8x256xf32>
    %16 = vector.broadcast %7 : vector<1x256xf32> to vector<8x256xf32>
    %17 = arith.addf %15, %16 : vector<8x256xf32>
    %cst_22 = arith.constant 0.000000e+00 : f32
    %18 = vector.broadcast %cst_22 : f32 to vector<8x256xf32>
    %19 = arith.maximumf %17, %18 : vector<8x256xf32>
    %cst_23 = arith.constant dense<0.000000e+00> : vector<8x128xf32>
    %20 = tpu.matmul %19, %5, %cst_23 {dimension_numbers = #tpu.dot_dimension_numbers<[1], [0], [0], [1], [0, 0, 1, 1], [], []>} : vector<8x256xf32>, vector<256x128xf32>, vector<8x128xf32> -> vector<8x128xf32>
    %21 = vector.broadcast %8 : vector<1x128xf32> to vector<8x128xf32>
    %22 = arith.addf %20, %21 : vector<8x128xf32>
    %cst_24 = arith.constant 0.000000e+00 : f32
    %23 = vector.broadcast %cst_24 : f32 to vector<8x128xf32>
    %24 = arith.maximumf %22, %23 : vector<8x128xf32>
    %cst_25 = arith.constant dense<0.000000e+00> : vector<8x128xf32>
    %25 = tpu.matmul %24, %1, %cst_25 {dimension_numbers = #tpu.dot_dimension_numbers<[1], [0], [0], [1], [0, 0, 1, 1], [], []>} : vector<8x128xf32>, vector<128x128xf32>, vector<8x128xf32> -> vector<8x128xf32>
    %26 = vector.broadcast %9 : vector<1x128xf32> to vector<8x128xf32>
    %27 = arith.addf %25, %26 : vector<8x128xf32>
    %cst_26 = arith.constant dense<0.000000e+00> : vector<8x128xf32>
    %28 = tpu.matmul %24, %2, %cst_26 {dimension_numbers = #tpu.dot_dimension_numbers<[1], [0], [0], [1], [0, 0, 1, 1], [], []>} : vector<8x128xf32>, vector<128x128xf32>, vector<8x128xf32> -> vector<8x128xf32>
    %29 = vector.broadcast %10 : vector<1x128xf32> to vector<8x128xf32>
    %30 = arith.addf %28, %29 : vector<8x128xf32>
    %c0_27 = arith.constant 0 : index
    %c0_28 = arith.constant 0 : index
    %31 = vector.load %arg2[%c0_27, %c0_28] : memref<8x128xf32, #tpu.memory_space<vmem>>, vector<8x128xf32>
    %cst_29 = arith.constant 5.000000e-01 : f32
    %32 = vector.broadcast %cst_29 : f32 to vector<8x128xf32>
    %33 = arith.mulf %32, %30 : vector<8x128xf32>
    %34 = math.exp %33 : vector<8x128xf32>
    %35 = arith.mulf %31, %34 : vector<8x128xf32>
    %36 = arith.addf %27, %35 : vector<8x128xf32>
    %cst_30 = arith.constant dense<0.000000e+00> : vector<8x128xf32>
    %37 = tpu.matmul %36, %3, %cst_30 {dimension_numbers = #tpu.dot_dimension_numbers<[1], [0], [0], [1], [0, 0, 1, 1], [], []>} : vector<8x128xf32>, vector<128x128xf32>, vector<8x128xf32> -> vector<8x128xf32>
    %38 = vector.broadcast %11 : vector<1x128xf32> to vector<8x128xf32>
    %39 = arith.addf %37, %38 : vector<8x128xf32>
    %cst_31 = arith.constant 0.000000e+00 : f32
    %40 = vector.broadcast %cst_31 : f32 to vector<8x128xf32>
    %41 = arith.maximumf %39, %40 : vector<8x128xf32>
    %cst_32 = arith.constant dense<0.000000e+00> : vector<8x256xf32>
    %42 = tpu.matmul %41, %4, %cst_32 {dimension_numbers = #tpu.dot_dimension_numbers<[1], [0], [0], [1], [0, 0, 1, 1], [], []>} : vector<8x128xf32>, vector<128x256xf32>, vector<8x256xf32> -> vector<8x256xf32>
    %43 = vector.broadcast %12 : vector<1x256xf32> to vector<8x256xf32>
    %44 = arith.addf %42, %43 : vector<8x256xf32>
    %cst_33 = arith.constant 0.000000e+00 : f32
    %45 = vector.broadcast %cst_33 : f32 to vector<8x256xf32>
    %46 = arith.maximumf %44, %45 : vector<8x256xf32>
    %cst_34 = arith.constant dense<0.000000e+00> : vector<8x128xf32>
    %47 = tpu.matmul %46, %6, %cst_34 {dimension_numbers = #tpu.dot_dimension_numbers<[1], [0], [0], [1], [0, 0, 1, 1], [], []>} : vector<8x256xf32>, vector<256x128xf32>, vector<8x128xf32> -> vector<8x128xf32>
    %48 = vector.broadcast %13 : vector<1x128xf32> to vector<8x128xf32>
    %49 = arith.addf %47, %48 : vector<8x128xf32>
    %50 = tpu.concatenate %49, %27, %30 in 1 : vector<8x128xf32>, vector<8x128xf32>, vector<8x128xf32> -> vector<8x384xf32>
    %c0_35 = arith.constant 0 : index
    %c0_36 = arith.constant 0 : index
    %51 = vector.load %arg7[%c0_35, %c0_36] : memref<8x384xf32, #tpu.memory_space<vmem>>, vector<8x384xf32>
    tpu.vector_store %arg7[%c0_35, %c0_36], %50 {strides = array<i32>} : memref<8x384xf32, #tpu.memory_space<vmem>>, vector<8x384xf32>,
    return
  }
  func.func @transform_0(%arg0: i32) -> (i32, i32) {
    %c0_i32 = arith.constant 0 : i32
    %c0_i32_0 = arith.constant 0 : i32
    return %arg0, %c0_i32 : i32, i32
  }
  func.func @transform_1(%arg0: i32) -> (i32, i32) {
    %c0_i32 = arith.constant 0 : i32
    %c0_i32_0 = arith.constant 0 : i32
    return %arg0, %c0_i32 : i32, i32
  }
  func.func @transform_2(%arg0: i32) -> (i32, i32) {
    %c0_i32 = arith.constant 0 : i32
    %c0_i32_0 = arith.constant 0 : i32
    %c0_i32_1 = arith.constant 0 : i32
    return %c0_i32, %c0_i32_0 : i32, i32
  }
  func.func @transform_3(%arg0: i32) -> (i32, i32) {
    %c0_i32 = arith.constant 0 : i32
    %c0_i32_0 = arith.constant 0 : i32
    %c0_i32_1 = arith.constant 0 : i32
    return %c0_i32, %c0_i32_0 : i32, i32
  }
  func.func @transform_4(%arg0: i32) -> (i32, i32) {
    %c0_i32 = arith.constant 0 : i32
    %c0_i32_0 = arith.constant 0 : i32
    %c0_i32_1 = arith.constant 0 : i32
    return %c0_i32, %c0_i32_0 : i32, i32
  }
  func.func @transform_5(%arg0: i32) -> (i32, i32) {
    %c0_i32 = arith.constant 0 : i32
    %c0_i32_0 = arith.constant 0 : i32
    %c0_i32_1 = arith.constant 0 : i32
    return %c0_i32, %c0_i32_0 : i32, i32
  }
  func.func @transform_6(%arg0: i32) -> (i32, i32) {
    %c0_i32 = arith.constant 0 : i32
    %c0_i32_0 = arith.constant 0 : i32
    return %arg0, %c0_i32 : i32, i32
  }
}

</mosaic_0001>

<bundles_post_ra>
// kernel: tpu_custom_call.1
= control target key start
LH: loop header
LB: loop body
LE: loop exit
PB: predicated region body
PF: predicated region fallthrough
CT: control target
= control target key end

     0   :  { %11 = vsyncpa [#allocation3], 0  ;;  %s1633_s0 = inlined_call_operand.hbm [shape: f32[8,128], index: 0, kind: input, shape index: {}]   ;;  %s1634_s1 = inlined_call_operand.hbm [shape: f32[8,128], index: 1, kind: input, shape index: {}]   ;;  %s1635_s2 = inlined_call_operand.hbm [shape: f32[128,256], index: 2, kind: input, shape index: {}]   ;;  %s1636_s3 = inlined_call_operand.hbm [shape: f32[128,640], index: 3, kind: input, shape index: {}]   ;;  %s1637_s4 = inlined_call_operand.hbm [shape: f32[256,256], index: 4, kind: input, shape index: {}]   ;;  %s1638_s5 = inlined_call_operand.vmem [shape: f32[1,1152], index: 5, kind: input, shape index: {}]   ;;  %s1639_s6 = inlined_call_operand.hbm [shape: f32[8,384], index: 6, kind: output, shape index: {}]  }
   0x1   :  { %12 = vsyncpa [#allocation6], 0 }
   0x2   :  { %13 = vsyncpa [#allocation9], 0 }
   0x3   :  { %14 = vsyncpa [#allocation4], 0  ;;  %s1434_s21 = smov [#allocation5]   ;;  %s1435_s23 = smov [#allocation8]  }
   0x4   :  { %s31_s22 = sshll.u32 %s1434_s21, 4  ;;  %s52_s24 = sshll.u32 %s1435_s23, 4  ;;  %s32_s22 = int_to_ptr.vmem [resolvable:$true] %s31_s22  ;;  %s1482_s24 = int_to_ptr.vmem [resolvable:$true] %s52_s24 }
   0x5   :  { %s1294_s27 = scalar_lea.hbm %s1634_s1, 128 }
   0x6   :  { %p1295_p0 = scmp.ne.s32.totalorder %s1634_s1, %s1294_s27  ;;  %p1298_p1 = scmp.lt.u32.totalorder %s1294_s27, %s1634_s1 }
   0x8   :  { %p1300_p2 = pnand %p1298_p1, %p1295_p0 }
   0xa   :  { %1303 = shalt.err (!%p1300_p2)
}
   0xb   :  { %s1304_s8 = scalar_lea.vmem %s32_s22, 128  ;;  %p1309_p4 = scmp.lt.s32.totalorder %s32_s22, %s32_s22 }
   0xc   :  { %p1305_p3 = scmp.ne.s32.totalorder %s32_s22, %s1304_s8  ;;  %p1310_p5 = scmp.lt.s32.totalorder %s1304_s8, %s1304_s8 }
   0xe   :  { %p1311_p6 = por %p1310_p5, %p1309_p4 }
  0x10   :  { %p1312_p7 = pnand %p1311_p6, %p1305_p3 }
  0x12   :  { %1315 = shalt.err (!%p1312_p7)
}
  0x13   :  { %34 = dma.hbm_to_vmem [thread:$0]  %s1634_s1, 128, %s32_s22, [#allocation6]  }
  0x14   :  { %s1316_s13 = scalar_lea.hbm %s1636_s3, 10240 }
  0x15   :  { %p1317_p8 = scmp.ne.s32.totalorder %s1636_s3, %s1316_s13  ;;  %p1320_p9 = scmp.lt.u32.totalorder %s1316_s13, %s1636_s3 }
  0x17   :  { %p1322_p10 = pnand %p1320_p9, %p1317_p8 }
  0x19   :  { %1325 = shalt.err (!%p1322_p10)
}
  0x1a   :  { %s1326_s18 = scalar_lea.vmem %s1482_s24, 10240  ;;  %p1331_p12 = scmp.lt.s32.totalorder %s1482_s24, %s1482_s24 }
  0x1b   :  { %p1327_p11 = scmp.ne.s32.totalorder %s1482_s24, %s1326_s18  ;;  %p1332_p13 = scmp.lt.s32.totalorder %s1326_s18, %s1326_s18 }
  0x1d   :  { %p1333_p0 = por %p1332_p13, %p1331_p12 }
  0x1f   :  { %p1334_p1 = pnand %p1333_p0, %p1327_p11 }
  0x21   :  { %1337 = shalt.err (!%p1334_p1)
}
  0x22   :  { %s1436_s1 = smov 640   ;;  %s1437_s19 = smov 40  }
  0x23   :  { %58 = dma.hbm_to_vmem [thread:$0]  %s1636_s3, 10240, %s1482_s24, [#allocation9], %s1436_s1, %s1436_s1, %s1437_s19  }
  0x24   :  { %s1438_s22 = smov [#allocation2]   ;;  %s1439_s25 = smov [#allocation7]  }
  0x25   :  { %s21_s23 = sshll.u32 %s1438_s22, 4  ;;  %s40_s26 = sshll.u32 %s1439_s25, 4  ;;  %s22_s23 = int_to_ptr.vmem [resolvable:$true] %s21_s23  ;;  %s1513_s26 = int_to_ptr.vmem [resolvable:$true] %s40_s26 }
  0x26   :  { %s1338_s29 = scalar_lea.hbm %s1633_s0, 128 }
  0x27   :  { %p1339_p2 = scmp.ne.s32.totalorder %s1633_s0, %s1338_s29  ;;  %p1342_p3 = scmp.lt.u32.totalorder %s1338_s29, %s1633_s0 }
  0x29   :  { %p1344_p4 = pnand %p1342_p3, %p1339_p2 }
  0x2b   :  { %1347 = shalt.err (!%p1344_p4)
}
  0x2c   :  { %s1348_s3 = scalar_lea.vmem %s22_s23, 128  ;;  %p1353_p6 = scmp.lt.s32.totalorder %s22_s23, %s22_s23 }
  0x2d   :  { %p1349_p5 = scmp.ne.s32.totalorder %s22_s23, %s1348_s3  ;;  %p1354_p7 = scmp.lt.s32.totalorder %s1348_s3, %s1348_s3 }
  0x2f   :  { %p1355_p8 = por %p1354_p7, %p1353_p6 }
  0x31   :  { %p1356_p9 = pnand %p1355_p8, %p1349_p5 }
  0x33   :  { %1359 = shalt.err (!%p1356_p9)
}
  0x34   :  { %24 = dma.hbm_to_vmem [thread:$0]  %s1633_s0, 128, %s22_s23, [#allocation3]  }
  0x35   :  { %s1360_s13 = scalar_lea.hbm %s1635_s2, 4096 }
  0x36   :  { %p1361_p10 = scmp.ne.s32.totalorder %s1635_s2, %s1360_s13  ;;  %p1364_p11 = scmp.lt.u32.totalorder %s1360_s13, %s1635_s2 }
  0x38   :  { %p1366_p12 = pnand %p1364_p11, %p1361_p10 }
  0x3a   :  { %1369 = shalt.err (!%p1366_p12)
}
  0x3b   :  { %s1370_s18 = scalar_lea.vmem %s1513_s26, 4096  ;;  %p1375_p0 = scmp.lt.s32.totalorder %s1513_s26, %s1513_s26 }
  0x3c   :  { %p1371_p13 = scmp.ne.s32.totalorder %s1513_s26, %s1370_s18  ;;  %p1376_p1 = scmp.lt.s32.totalorder %s1370_s18, %s1370_s18 }
  0x3e   :  { %p1377_p2 = por %p1376_p1, %p1375_p0 }
  0x40   :  { %p1378_p3 = pnand %p1377_p2, %p1371_p13 }
  0x42   :  { %1381 = shalt.err (!%p1378_p3)
}
  0x43   :  { %s1440_s0 = smov 256   ;;  %s1441_s1 = smov 16  }
  0x44   :  { %46 = dma.hbm_to_vmem [thread:$0]  %s1635_s2, 4096, %s1513_s26, [#allocation6], %s1440_s0, %s1440_s0, %s1441_s1  }
  0x45   :  { %s1442_s21 = smov [#allocation10]   ;;  %s1382_s27 = scalar_lea.hbm %s1637_s4, 8192 }
  0x46   :  { %s64_s22 = sshll.u32 %s1442_s21, 4  ;;  %p1383_p4 = scmp.ne.s32.totalorder %s1637_s4, %s1382_s27  ;;  %s65_s22 = int_to_ptr.vmem [resolvable:$true] %s64_s22 }
  0x47   :  { %p1386_p5 = scmp.lt.u32.totalorder %s1382_s27, %s1637_s4 }
  0x49   :  { %p1388_p6 = pnand %p1386_p5, %p1383_p4 }
  0x4b   :  { %1391 = shalt.err (!%p1388_p6)
}
  0x4c   :  { %s1392_s8 = scalar_lea.vmem %s65_s22, 8192  ;;  %p1397_p8 = scmp.lt.s32.totalorder %s65_s22, %s65_s22 }
  0x4d   :  { %p1393_p7 = scmp.ne.s32.totalorder %s65_s22, %s1392_s8  ;;  %p1398_p9 = scmp.lt.s32.totalorder %s1392_s8, %s1392_s8 }
  0x4f   :  { %p1399_p10 = por %p1398_p9, %p1397_p8 }
  0x51   :  { %p1400_p11 = pnand %p1399_p10, %p1393_p7 }
  0x53   :  { %1403 = shalt.err (!%p1400_p11)
}
  0x54   :  { %70 = dma.hbm_to_vmem [thread:$0]  %s1637_s4, 8192, %s65_s22, [#allocation9], %s1440_s0, %s1440_s0, %s1441_s1  }
  0x55   :  { %1426 = dma.done.wait [#allocation3], 128  }
  0x56   :  { %1427 = vsyncadd [#allocation3], 4294967168 }
  0x57   :  { %1428 = dma.done.wait [#allocation6], 4224  }
  0x58   :  { %1429 = vsyncadd [#allocation6], 4294963072 }
  0x59   :  { %1430 = dma.done.wait [#allocation9], 18432  }
  0x5a   :  { %1431 = vsyncadd [#allocation9], 4294948864  ;;  %v1443_v0 = vmov 0.0   ;;  %v89_v1 = vld [vmem:[#allocation7 + $0x8] sm:$0xff]  ;;  %v91_v2 = vld [vmem:[#allocation7 + $0x18] sm:$0xff]  ;;  %vm1445_vm0 = vmmov 0  }
  0x5b   :  { %347 = vmatprep.mubr.f32.mxu0 %v1443_v0  ;;  %v88_v3 = vld [vmem:[#allocation7] sm:$0xff]  ;;  %v1079_v4 = vpack.c.bf16 %v91_v2, %v89_v1  ;;  %v90_v5 = vld [vmem:[#allocation7 + $0x10] sm:$0xff]  ;;  %v93_v6 = vld [vmem:[#allocation7 + $0x28] sm:$0xff]  ;;  %s1446_s1 = smov [#allocation11]  }
  0x5c   :  { %v95_v7 = vld [vmem:[#allocation7 + $0x38] sm:$0xff]  ;;  %v1081_v8 = vpack.c.bf16 %v90_v5, %v88_v3  ;;  %v92_v10 = vld [vmem:[#allocation7 + $0x20] sm:$0xff]  ;;  %v94_v11 = vld [vmem:[#allocation7 + $0x30] sm:$0xff]  ;;  %s837_s19 = sshll.u32 %s1446_s1, 4  ;;  %s838_s19 = int_to_ptr.vmem [resolvable:$true] %s837_s19 }
  0x5d   :  { %v1083_v9 = vpack.c.bf16 %v95_v7, %v93_v6  ;;  %v97_v12 = vld [vmem:[#allocation7 + $0x48] sm:$0xff]  ;;  %1080 = vmatprep.subr.bf16.mxu0 %v1079_v4  ;;  %v99_v13 = vld [vmem:[#allocation7 + $0x58] sm:$0xff]  ;;  %v1085_v14 = vpack.c.bf16 %v94_v11, %v92_v10  ;;  %v96_v16 = vld [vmem:[#allocation7 + $0x40] sm:$0xff]  ;;  %s1404_s20 = scalar_lea.vmem %s838_s19, 384  ;;  %p1409_p13 = scmp.lt.s32.totalorder %s838_s19, %s838_s19 }
  0x5e   :  { %1082 = vmatpush1.bf16.msra.mxu0 %v1081_v8  ;;  %v1087_v15 = vpack.c.bf16 %v99_v13, %v97_v12  ;;  %v98_v17 = vld [vmem:[#allocation7 + $0x50] sm:$0xff]  ;;  %v101_v18 = vld [vmem:[#allocation7 + $0x68] sm:$0xff]  ;;  %v103_v19 = vld [vmem:[#allocation7 + $0x78] sm:$0xff]  ;;  %p1405_p12 = scmp.ne.s32.totalorder %s838_s19, %s1404_s20  ;;  %p1410_p0 = scmp.lt.s32.totalorder %s1404_s20, %s1404_s20 }
  0x5f   :  { %1084 = vmatprep.subr.bf16.mxu0 %v1083_v9  ;;  %v1089_v20 = vpack.c.bf16 %v98_v17, %v96_v16  ;;  %v1091_v21 = vpack.c.bf16 %v103_v19, %v101_v18  ;;  %v100_v22 = vld [vmem:[#allocation7 + $0x60] sm:$0xff]  ;;  %v102_v23 = vld [vmem:[#allocation7 + $0x70] sm:$0xff]  ;;  %v105_v24 = vld [vmem:[#allocation7 + $0x88] sm:$0xff] }
  0x60   :  { %v107_v25 = vld [vmem:[#allocation7 + $0x98] sm:$0xff]  ;;  %v104_v26 = vld [vmem:[#allocation7 + $0x80] sm:$0xff]  ;;  %v106_v27 = vld [vmem:[#allocation7 + $0x90] sm:$0xff]  ;;  %v1093_v31 = vpack.c.bf16 %v102_v23, %v100_v22  ;;  %p1411_p1 = por %p1410_p0, %p1409_p13 }
  0x61   :  { %v216_v28 = vld [vmem:[#allocation10 + $0x100] sm:$0xff]  ;;  %v217_v29 = vld [vmem:[#allocation10 + $0x110] sm:$0xff]  ;;  %v1095_v36 = vpack.c.bf16 %v107_v25, %v105_v24  ;;  %v109_v42 = vld [vmem:[#allocation7 + $0xa8] sm:$0xff]  ;;  %v1097_v46 = vpack.c.bf16 %v106_v27, %v104_v26 }
  0x62   :  { %1086 = vmatpush1.bf16.msra.mxu0 %v1085_v14  ;;  %v200_v30 = vld [vmem:[#allocation10] sm:$0xff]  ;;  %v1111_v32 = vpack.c.bf16 %v217_v29, %v216_v28  ;;  %v201_v33 = vld [vmem:[#allocation10 + $0x10] sm:$0xff]  ;;  %v111_v43 = vld [vmem:[#allocation7 + $0xb8] sm:$0xff]  ;;  %p1412_p2 = pnand %p1411_p1, %p1405_p12 }
  0x63   :  { %1088 = vmatprep.subr.bf16.mxu0 %v1087_v15  ;;  %v218_v34 = vld [vmem:[#allocation10 + $0x120] sm:$0xff]  ;;  %v219_v35 = vld [vmem:[#allocation10 + $0x130] sm:$0xff]  ;;  %v1113_v37 = vpack.c.bf16 %v201_v33, %v200_v30  ;;  %v1099_v51 = vpack.c.bf16 %v111_v43, %v109_v42  ;;  %v113_v55 = vld [vmem:[#allocation7 + $0xc8] sm:$0xff] }
  0x64   :  { %v1115_v38 = vpack.c.bf16 %v219_v35, %v218_v34  ;;  %v202_v39 = vld [vmem:[#allocation10 + $0x20] sm:$0xff]  ;;  %v203_v40 = vld [vmem:[#allocation10 + $0x30] sm:$0xff]  ;;  %1112 = vmatprep.subr.bf16.mxu1 %v1111_v32  ;;  %v115_v56 = vld [vmem:[#allocation7 + $0xd8] sm:$0xff] }
  0x65   :  { %v220_v41 = vld [vmem:[#allocation10 + $0x140] sm:$0xff]  ;;  %v221_v44 = vld [vmem:[#allocation10 + $0x150] sm:$0xff]  ;;  %1114 = vmatpush3.bf16.msra.mxu1 %v1113_v37  ;;  %v1117_v45 = vpack.c.bf16 %v203_v40, %v202_v39  ;;  %v1103_v63 = vpack.c.bf16 %v115_v56, %v113_v55  ;;  %v117_v4 = vld [vmem:[#allocation7 + $0xe8] sm:$0xff]  ;;  %v1444_v37 = vmov 0.0|0.0  }
  0x66   :  { %1090 = vmatpush1.bf16.msra.mxu0 %v1089_v20  ;;  %v108_v47 = vld [vmem:[#allocation7 + $0xa0] sm:$0xff]  ;;  %1116 = vmatprep.subr.bf16.mxu1 %v1115_v38  ;;  %v1119_v48 = vpack.c.bf16 %v221_v44, %v220_v41  ;;  %v205_v50 = vld [vmem:[#allocation10 + $0x50] sm:$0xff]  ;;  %v119_v5 = vld [vmem:[#allocation7 + $0xf8] sm:$0xff] }
  0x67   :  { %1092 = vmatprep.subr.bf16.mxu0 %v1091_v21  ;;  %v204_v49 = vld [vmem:[#allocation10 + $0x40] sm:$0xff]  ;;  %v110_v52 = vld [vmem:[#allocation7 + $0xb0] sm:$0xff]  ;;  %v1107_v12 = vpack.c.bf16 %v119_v5, %v117_v4  ;;  %v123_v40 = vld [vmem:[#allocation8 + $0x78] sm:$0xff] }
  0x68   :  { %v222_v53 = vld [vmem:[#allocation10 + $0x160] sm:$0xff]  ;;  %v223_v54 = vld [vmem:[#allocation10 + $0x170] sm:$0xff]  ;;  %v1121_v57 = vpack.c.bf16 %v205_v50, %v204_v49  ;;  %v1101_v58 = vpack.c.bf16 %v110_v52, %v108_v47  ;;  %v125_v43 = vld [vmem:[#allocation8 + $0xc8] sm:$0xff] }
  0x69   :  { %1118 = vmatpush3.bf16.msra.mxu1 %v1117_v45  ;;  %v112_v59 = vld [vmem:[#allocation7 + $0xc0] sm:$0xff]  ;;  %v1123_v60 = vpack.c.bf16 %v223_v54, %v222_v53  ;;  %v207_v62 = vld [vmem:[#allocation10 + $0x70] sm:$0xff]  ;;  %v129_v49 = vld [vmem:[#allocation8 + $0x168] sm:$0xff]  ;;  %v273_v54 = vlaneseq }
  0x6a   :  { %1094 = vmatpush1.bf16.msra.mxu0 %v1093_v31  ;;  %1120 = vmatprep.subr.bf16.mxu1 %v1119_v48  ;;  %v206_v61 = vld [vmem:[#allocation10 + $0x60] sm:$0xff]  ;;  %v114_v1 = vld [vmem:[#allocation7 + $0xd0] sm:$0xff]  ;;  %v131_v52 = vld [vmem:[#allocation8 + $0x1b8] sm:$0xff] }
  0x6b   :  { %1096 = vmatprep.subr.bf16.mxu0 %v1095_v36  ;;  %v224_v2 = vld [vmem:[#allocation10 + $0x180] sm:$0xff]  ;;  %v225_v3 = vld [vmem:[#allocation10 + $0x190] sm:$0xff]  ;;  %v1125_v6 = vpack.c.bf16 %v207_v62, %v206_v61  ;;  %v1105_v7 = vpack.c.bf16 %v114_v1, %v112_v59  ;;  %v121_v36 = vld [vmem:[#allocation8 + $0x28] sm:$0xff]  ;;  %v1565_v55 = vshrl.u32 %v273_v54, 7 }
  0x6c   :  { %v116_v8 = vld [vmem:[#allocation7 + $0xe0] sm:$0xff]  ;;  %v1127_v9 = vpack.c.bf16 %v225_v3, %v224_v2  ;;  %v209_v11 = vld [vmem:[#allocation10 + $0x90] sm:$0xff]  ;;  %v136_v1 = vld [vmem:[#allocation8 + $0x8] sm:$0xff] }
  0x6d   :  { %1122 = vmatpush3.bf16.msra.mxu1 %v1121_v57  ;;  %v208_v10 = vld [vmem:[#allocation10 + $0x80] sm:$0xff]  ;;  %v118_v13 = vld [vmem:[#allocation7 + $0xf0] sm:$0xff]  ;;  %v275_v56 = vsub.s32 0, %v1565_v55  ;;  %v161_v54 = vld [vmem:[#allocation8 + $0x178] sm:$0xff] }
  0x6e   :  { %1098 = vmatpush1.bf16.msra.mxu0 %v1097_v46  ;;  %1124 = vmatprep.subr.bf16.mxu1 %v1123_v60  ;;  %v226_v14 = vld [vmem:[#allocation10 + $0x1a0] sm:$0xff]  ;;  %v227_v15 = vld [vmem:[#allocation10 + $0x1b0] sm:$0xff]  ;;  %v1129_v16 = vpack.c.bf16 %v209_v11, %v208_v10  ;;  %v1109_v17 = vpack.c.bf16 %v118_v13, %v116_v8  ;;  %v127_v46 = vld [vmem:[#allocation8 + $0x118] sm:$0xff] }
  0x6f   :  { %1100 = vmatprep.subr.bf16.mxu0 %v1099_v51  ;;  %v1131_v18 = vpack.c.bf16 %v227_v15, %v226_v14  ;;  %v210_v19 = vld [vmem:[#allocation10 + $0xa0] sm:$0xff]  ;;  %v211_v20 = vld [vmem:[#allocation10 + $0xb0] sm:$0xff]  ;;  %v140_v10 = vld [vmem:[#allocation8 + $0xa8] sm:$0xff] }
  0x70   :  { %v228_v21 = vld [vmem:[#allocation10 + $0x1c0] sm:$0xff]  ;;  %v229_v22 = vld [vmem:[#allocation10 + $0x1d0] sm:$0xff]  ;;  %v1133_v23 = vpack.c.bf16 %v211_v20, %v210_v19  ;;  %v142_v13 = vld [vmem:[#allocation8 + $0xf8] sm:$0xff] }
  0x71   :  { %1126 = vmatpush3.bf16.msra.mxu1 %v1125_v6  ;;  %v271_v24 = vld [vmem:[#allocation2] sm:$0xff]  ;;  %v1135_v25 = vpack.c.bf16 %v229_v22, %v228_v21  ;;  %v212_v26 = vld [vmem:[#allocation10 + $0xc0] sm:$0xff]  ;;  %v146_v19 = vld [vmem:[#allocation8 + $0x198] sm:$0xff] }
  0x72   :  { %1102 = vmatpush1.bf16.msra.mxu0 %v1101_v58  ;;  %1128 = vmatprep.subr.bf16.mxu1 %v1127_v9  ;;  %v213_v27 = vld [vmem:[#allocation10 + $0xd0] sm:$0xff]  ;;  %v230_v29 = vld [vmem:[#allocation10 + $0x1e0] sm:$0xff]  ;;  %v279_v58 = vsub.s32 1, %v1565_v55 }
  0x73   :  { %1104 = vmatprep.subr.bf16.mxu0 %v1103_v63  ;;  %v1137_v28 = vpack.c.bf16 %v213_v27, %v212_v26  ;;  %v231_v30 = vld [vmem:[#allocation10 + $0x1f0] sm:$0xff]  ;;  %v214_v32 = vld [vmem:[#allocation10 + $0xe0] sm:$0xff] }
  0x74   :  { %v1139_v31 = vpack.c.bf16 %v231_v30, %v230_v29  ;;  %v215_v33 = vld [vmem:[#allocation10 + $0xf0] sm:$0xff]  ;;  %v120_v35 = vld [vmem:[#allocation8] sm:$0xff]  ;;  %v135_v29 = vld [vmem:[#allocation8 + $0x258] sm:$0xff] }
  0x75   :  { %1130 = vmatpush3.bf16.msra.mxu1 %v1129_v16  ;;  %v1141_v34 = vpack.c.bf16 %v215_v33, %v214_v32  ;;  %v1144_v38 = vpack.c.bf16 %v121_v36, %v120_v35  ;;  %v122_v39 = vld [vmem:[#allocation8 + $0x50] sm:$0xff]  ;;  %v124_v42 = vld [vmem:[#allocation8 + $0xa0] sm:$0xff]  ;;  %v144_v16 = vld [vmem:[#allocation8 + $0x148] sm:$0xff] }
  0x76   :  { %1106 = vmatpush1.bf16.msra.mxu0 %v1105_v7  ;;  %1132 = vmatprep.subr.bf16.mxu1 %v1131_v18  ;;  %v1147_v41 = vpack.c.bf16 %v123_v40, %v122_v39  ;;  %v1150_v44 = vpack.c.bf16 %v125_v43, %v124_v42  ;;  %v126_v45 = vld [vmem:[#allocation8 + $0xf0] sm:$0xff]  ;;  %v128_v48 = vld [vmem:[#allocation8 + $0x140] sm:$0xff]  ;;  %v138_v7 = vld [vmem:[#allocation8 + $0x58] sm:$0xff] }
  0x77   :  { %1108 = vmatprep.subr.bf16.mxu0 %v1107_v12  ;;  %v1153_v47 = vpack.c.bf16 %v127_v46, %v126_v45  ;;  %v1156_v50 = vpack.c.bf16 %v129_v49, %v128_v48  ;;  %v130_v51 = vld [vmem:[#allocation8 + $0x190] sm:$0xff]  ;;  %v264_v57 = vld [vmem:[%s1638_s5] sm:$0x3]  ;;  %v150_v30 = vld [vmem:[#allocation8 + $0x238] sm:$0xff] }
  0x78   :  { %v1159_v53 = vpack.c.bf16 %v131_v52, %v130_v51  ;;  %v276_v59 = vrot.slane %v264_v57, %v275_v56  ;;  %v280_v60 = vrot.slane %v264_v57, %v279_v58  ;;  %v137_v2 = vld [vmem:[#allocation8 + $0x30] sm:$0xff]  ;;  %v139_v8 = vld [vmem:[#allocation8 + $0x80] sm:$0xff]  ;;  %v153_v40 = vld [vmem:[#allocation8 + $0x38] sm:$0xff] }
  0x79   :  { %1134 = vmatpush3.bf16.msra.mxu1 %v1133_v23  ;;  %v1168_v5 = vpack.c.bf16 %v137_v2, %v136_v1  ;;  %v1171_v9 = vpack.c.bf16 %v139_v8, %v138_v7  ;;  %v141_v11 = vld [vmem:[#allocation8 + $0xd0] sm:$0xff]  ;;  %v143_v14 = vld [vmem:[#allocation8 + $0x120] sm:$0xff]  ;;  %v133_v23 = vld [vmem:[#allocation8 + $0x208] sm:$0xff] }
  0x7a   :  { %1110 = vmatpush1.bf16.msra.mxu0 %v1109_v17  ;;  %1136 = vmatprep.subr.bf16.mxu1 %v1135_v25  ;;  %v1174_v12 = vpack.c.bf16 %v141_v11, %v140_v10  ;;  %v1177_v15 = vpack.c.bf16 %v143_v14, %v142_v13  ;;  %v145_v17 = vld [vmem:[#allocation8 + $0x170] sm:$0xff]  ;;  %v147_v20 = vld [vmem:[#allocation8 + $0x1c0] sm:$0xff]  ;;  %v155_v45 = vld [vmem:[#allocation8 + $0x88] sm:$0xff] }
  0x7b   :  { %1143 = vmatprep.subr.bf16.mxu0 %v1444_v37  ;;  %v1180_v18 = vpack.c.bf16 %v145_v17, %v144_v16  ;;  %v1183_v21 = vpack.c.bf16 %v147_v20, %v146_v19  ;;  %v132_v22 = vld [vmem:[#allocation8 + $0x1e0] sm:$0xff]  ;;  %v149_v26 = vld [vmem:[#allocation8 + $0x210] sm:$0xff]  ;;  %v157_v48 = vld [vmem:[#allocation8 + $0xd8] sm:$0xff] }
  0x7c   :  { %v1162_v25 = vpack.c.bf16 %v133_v23, %v132_v22  ;;  %v151_v32 = vld [vmem:[#allocation8 + $0x260] sm:$0xff]  ;;  %v152_v39 = vld [vmem:[#allocation8 + $0x10] sm:$0xff]  ;;  %v159_v51 = vld [vmem:[#allocation8 + $0x128] sm:$0xff] }
  0x7d   :  { %348 = vmatmul.mubr.f32.vlgmr.msra.gmra.mrb[0].mxu0 %v271_v24  ;;  %1138 = vmatpush3.bf16.msra.mxu1 %v1137_v28  ;;  %v148_v24 = vld [vmem:[#allocation8 + $0x1e8] sm:$0xff]  ;;  %v134_v28 = vld [vmem:[#allocation8 + $0x230] sm:$0xff]  ;;  %v1189_v33 = vpack.c.bf16 %v151_v32, %v150_v30  ;;  %v848_v35 = vld [vmem:[%s1638_s5 + $0x2] ss:$0 sm:$0xff]  ;;  %v1192_v42 = vpack.c.bf16 %v153_v40, %v152_v39 }
  0x7e   :  { %1140 = vmatprep.subr.bf16.mxu1 %v1139_v31  ;;  %1145 = vmatpush3.bf16.msra.mxu0 %v1144_v38  ;;  %v1186_v27 = vpack.c.bf16 %v149_v26, %v148_v24  ;;  %v1165_v31 = vpack.c.bf16 %v135_v29, %v134_v28  ;;  %v166_v1 = vld [vmem:[#allocation8 + $0x240] sm:$0xff]  ;;  %v167_v2 = vld [vmem:[#allocation8 + $0x268] sm:$0xff]  ;;  %v175_v10 = vld [vmem:[#allocation8 + $0x98] sm:$0xff] }
  0x7f   :  { %1146 = vmatprep.subr.bf16.mxu0 %v1444_v37  ;;  %1006 = vmatprep.mubr.msk.f32.mxu0 %vm1445_vm0, %v1443_v0  ;;  %v170_v8 = vld [vmem:[#allocation8 + $0x40] sm:$0xff]  ;;  %v172_v13 = vld [vmem:[#allocation8 + $0x68] sm:$0xff]  ;;  %v174_v14 = vld [vmem:[#allocation8 + $0x90] sm:$0xff] }
  0x80   :  { %v179_v16 = vld [vmem:[#allocation8 + $0xe8] sm:$0xff]  ;;  %v1221_v17 = vpack.c.bf16 %v174_v14, %v172_v13  ;;  %v178_v19 = vld [vmem:[#allocation8 + $0xe0] sm:$0xff]  ;;  %v181_v20 = vld [vmem:[#allocation8 + $0x110] sm:$0xff] }
  0x81   :  { %1142 = vmatpush3.bf16.msra.mxu1 %v1141_v34  ;;  %v180_v24 = vld [vmem:[#allocation8 + $0x108] sm:$0xff]  ;;  %v185_v26 = vld [vmem:[#allocation8 + $0x160] sm:$0xff]  ;;  %v184_v30 = vld [vmem:[#allocation8 + $0x158] sm:$0xff] }
  0x82   :  { %1167 = vmatprep.subr.bf16.mxu1 %v1444_v37  ;;  %1148 = vmatpush3.bf16.msra.mxu0 %v1147_v41  ;;  %v189_v32 = vld [vmem:[#allocation8 + $0x1b0] sm:$0xff]  ;;  %v193_v39 = vld [vmem:[#allocation8 + $0x200] sm:$0xff]  ;;  %v195_v40 = vld [vmem:[#allocation8 + $0x228] sm:$0xff] }
  0x83   :  { %1149 = vmatprep.subr.bf16.mxu0 %v1444_v37  ;;  %v234_v14 = vld [vmem:[#allocation10 + $0x28] sm:$0xff] }
  0x86   :  { %1151 = vmatpush3.bf16.msra.mxu0 %v1150_v44  ;;  %v154_v44 = vld [vmem:[#allocation8 + $0x60] sm:$0xff] }
  0x87   :  { %1152 = vmatprep.subr.bf16.mxu0 %v1444_v37  ;;  %v1195_v46 = vpack.c.bf16 %v155_v45, %v154_v44  ;;  %v194_v44 = vld [vmem:[#allocation8 + $0x220] sm:$0xff] }
  0x8a   :  { %1154 = vmatpush3.bf16.msra.mxu0 %v1153_v47  ;;  %v156_v47 = vld [vmem:[#allocation8 + $0xb0] sm:$0xff] }
  0x8b   :  { %1155 = vmatprep.subr.bf16.mxu0 %v1444_v37  ;;  %v1198_v49 = vpack.c.bf16 %v157_v48, %v156_v47  ;;  %v850_v47 = vld [vmem:[%s1638_s5 + $0x4] ss:$0 sm:$0xff] }
  0x8e   :  { %1157 = vmatpush3.bf16.msra.mxu0 %v1156_v50  ;;  %v158_v50 = vld [vmem:[#allocation8 + $0x100] sm:$0xff] }
  0x8f   :  { %1158 = vmatprep.subr.bf16.mxu0 %v1444_v37  ;;  %v1201_v52 = vpack.c.bf16 %v159_v51, %v158_v50 }
  0x92   :  { %1160 = vmatpush3.bf16.msra.mxu0 %v1159_v53  ;;  %v160_v53 = vld [vmem:[#allocation8 + $0x150] sm:$0xff] }
  0x93   :  { %1161 = vmatprep.subr.bf16.mxu0 %v1444_v37  ;;  %v1204_v57 = vpack.c.bf16 %v161_v54, %v160_v53 }
  0x96   :  { %1163 = vmatpush3.bf16.msra.mxu0 %v1162_v25  ;;  %v182_v25 = vld [vmem:[#allocation8 + $0x130] sm:$0xff] }
  0x97   :  { %1164 = vmatprep.subr.bf16.mxu0 %v1444_v37  ;;  %v1229_v28 = vpack.c.bf16 %v182_v25, %v180_v24  ;;  %v238_v25 = vld [vmem:[#allocation10 + $0x68] sm:$0xff] }
  0x9a   :  { %1166 = vmatpush3.bf16.msra.mxu0 %v1165_v31  ;;  %v186_v31 = vld [vmem:[#allocation8 + $0x180] sm:$0xff] }
  0x9b   :  { %1191 = vmatprep.subr.bf16.mxu0 %v1444_v37 }
 0x150   :  { %v349_v61 = vpop.f32.mrb[0].mxu0 }
 0x151   :  { %v350_v62 = vadd.f32 %v349_v61, %v276_v59  ;;  %v351_v63 = vpop.f32.mrb[1].mxu0  ;;  %v162_v59 = vld [vmem:[#allocation8 + $0x1a0] sm:$0xff]  ;;  %v164_v61 = vld [vmem:[#allocation8 + $0x1f0] sm:$0xff] }
 0x152   :  { %v352_v3 = vadd.f32 %v351_v63, %v280_v60  ;;  %v163_v60 = vld [vmem:[#allocation8 + $0x1c8] sm:$0xff] }
 0x153   :  { %v354_v6 = vmax.f32 %v350_v62, 0.0  ;;  %v165_v62 = vld [vmem:[#allocation8 + $0x218] sm:$0xff] }
 0x154   :  { %v355_v4 = vmax.f32 %v352_v3, 0.0  ;;  %v1210_v63 = vpack.c.bf16 %v165_v62, %v164_v61  ;;  %v1213_v3 = vpack.c.bf16 %v167_v2, %v166_v1  ;;  %v197_v62 = vld [vmem:[#allocation8 + $0x250] sm:$0xff]  ;;  %v196_v2 = vld [vmem:[#allocation8 + $0x248] sm:$0xff] }
 0x156   :  { %426 = vmatprep.mubr.f32.mxu1 %v355_v4  ;;  %v169_v4 = vld [vmem:[#allocation8 + $0x20] sm:$0xff] }
 0x157   :  { %427 = vmatmul.mubr.f32.vlgmr.msra.gmra.mrb[0].mxu1 %v354_v6  ;;  %v168_v6 = vld [vmem:[#allocation8 + $0x18] sm:$0xff] }
 0x158   :  { %1169 = vmatpush3.bf16.msra.mxu1 %v1168_v5  ;;  %1041 = vmatprep.mubr.msk.f32.mxu1 %vm1445_vm0, %v1443_v0  ;;  %v171_v5 = vld [vmem:[#allocation8 + $0x48] sm:$0xff]  ;;  %v1217_v11 = vpack.c.bf16 %v170_v8, %v168_v6  ;;  %v249_v6 = vld [vmem:[#allocation10 + $0x118] sm:$0xff] }
 0x159   :  { %1170 = vmatprep.subr.bf16.mxu1 %v1444_v37  ;;  %v1215_v7 = vpack.c.bf16 %v171_v5, %v169_v4  ;;  %v248_v5 = vld [vmem:[#allocation10 + $0x108] sm:$0xff] }
 0x15a   :  { %v1247_v8 = vpack.c.bf16 %v249_v6, %v248_v5 }
 0x15c   :  { %1172 = vmatpush3.bf16.msra.mxu1 %v1171_v9  ;;  %v173_v9 = vld [vmem:[#allocation8 + $0x70] sm:$0xff] }
 0x15d   :  { %1173 = vmatprep.subr.bf16.mxu1 %v1444_v37 }
 0x160   :  { %1175 = vmatpush3.bf16.msra.mxu1 %v1174_v12  ;;  %v1219_v12 = vpack.c.bf16 %v175_v10, %v173_v9  ;;  %v233_v9 = vld [vmem:[#allocation10 + $0x18] sm:$0xff]  ;;  %v250_v10 = vld [vmem:[#allocation10 + $0x128] sm:$0xff] }
 0x161   :  { %1176 = vmatprep.subr.bf16.mxu1 %v1444_v37 }
 0x164   :  { %1178 = vmatpush3.bf16.msra.mxu1 %v1177_v15  ;;  %v177_v15 = vld [vmem:[#allocation8 + $0xc0] sm:$0xff] }
 0x165   :  { %1179 = vmatprep.subr.bf16.mxu1 %v1444_v37 }
 0x168   :  { %1181 = vmatpush3.bf16.msra.mxu1 %v1180_v18  ;;  %v1223_v18 = vpack.c.bf16 %v179_v16, %v177_v15  ;;  %v235_v15 = vld [vmem:[#allocation10 + $0x38] sm:$0xff]  ;;  %v252_v16 = vld [vmem:[#allocation10 + $0x148] sm:$0xff] }
 0x169   :  { %1182 = vmatprep.subr.bf16.mxu1 %v1444_v37 }
 0x16c   :  { %1184 = vmatpush3.bf16.msra.mxu1 %v1183_v21  ;;  %v183_v21 = vld [vmem:[#allocation8 + $0x138] sm:$0xff] }
 0x16d   :  { %1185 = vmatprep.subr.bf16.mxu1 %v1444_v37  ;;  %v1227_v23 = vpack.c.bf16 %v183_v21, %v181_v20  ;;  %v237_v20 = vld [vmem:[#allocation10 + $0x58] sm:$0xff]  ;;  %v254_v21 = vld [vmem:[#allocation10 + $0x168] sm:$0xff] }
 0x170   :  { %1187 = vmatpush3.bf16.msra.mxu1 %v1186_v27  ;;  %v187_v27 = vld [vmem:[#allocation8 + $0x188] sm:$0xff] }
 0x171   :  { %1188 = vmatprep.subr.bf16.mxu1 %v1444_v37  ;;  %v1231_v29 = vpack.c.bf16 %v187_v27, %v185_v26  ;;  %v239_v26 = vld [vmem:[#allocation10 + $0x78] sm:$0xff]  ;;  %v256_v27 = vld [vmem:[#allocation10 + $0x188] sm:$0xff] }
 0x174   :  { %1190 = vmatpush3.bf16.msra.mxu1 %v1189_v33  ;;  %v191_v33 = vld [vmem:[#allocation8 + $0x1d8] sm:$0xff] }
 0x175   :  { %1216 = vmatprep.subr.bf16.mxu1 %v1215_v7  ;;  %v232_v7 = vld [vmem:[#allocation10 + $0x8] sm:$0xff] }
 0x22a   :  { %v885_v34 = vpop.f32.mrb[0].mxu1 }
 0x22b   :  { %v886_v36 = vpop.f32.mrb[1].mxu1 }
 0x22c   :  { %v887_v38 = vadd.f32 %v886_v36, %v885_v34  ;;  %v1233_v34 = vpack.c.bf16 %v186_v31, %v184_v30  ;;  %v188_v36 = vld [vmem:[#allocation8 + $0x1a8] sm:$0xff] }
 0x22d   :  { %v240_v31 = vld [vmem:[#allocation10 + $0x88] sm:$0xff] }
 0x22e   :  { %v429_v41 = vadd.f32 %v887_v38, %v848_v35  ;;  %v1235_v35 = vpack.c.bf16 %v191_v33, %v189_v32  ;;  %v190_v38 = vld [vmem:[#allocation8 + $0x1d0] sm:$0xff]  ;;  %v241_v32 = vld [vmem:[#allocation10 + $0x98] sm:$0xff]  ;;  %v258_v33 = vld [vmem:[#allocation10 + $0x1a8] sm:$0xff] }
 0x230   :  { %v432_v43 = vmax.f32 %v429_v41, 0.0  ;;  %v1237_v41 = vpack.c.bf16 %v190_v38, %v188_v36  ;;  %v242_v38 = vld [vmem:[#allocation10 + $0xa8] sm:$0xff] }
 0x232   :  { %1007 = vmatmul.mubr.f32.vlgmr.msra.gmra.mrb[2].mxu0 %v432_v43  ;;  %1042 = vmatmul.mubr.f32.vlgmr.msra.gmra.mrb[2].mxu1 %v432_v43  ;;  %v192_v43 = vld [vmem:[#allocation8 + $0x1f8] sm:$0xff] }
 0x233   :  { %1193 = vmatpush3.bf16.msra.mxu0 %v1192_v42  ;;  %1076 = vmatprep.mubr.msk.f32.mxu0 %vm1445_vm0, %v1443_v0  ;;  %v1239_v42 = vpack.c.bf16 %v195_v40, %v193_v39  ;;  %v1241_v45 = vpack.c.bf16 %v194_v44, %v192_v43  ;;  %v243_v39 = vld [vmem:[#allocation10 + $0xb8] sm:$0xff]  ;;  %v260_v40 = vld [vmem:[#allocation10 + $0x1c8] sm:$0xff]  ;;  %v851_v44 = vld [vmem:[%s1638_s5 + $0x5] ss:$0 sm:$0xff] }
 0x234   :  { %1194 = vmatprep.subr.bf16.mxu0 %v1444_v37  ;;  %743 = vmatprep.mubr.f32.mxu1 %v1443_v0  ;;  %v1207_v0 = vpack.c.bf16 %v163_v60, %v162_v59  ;;  %v585_v59 = vld [vmem:[#allocation5] sm:$0xff] }
 0x235   :  { %1218 = vmatpush1.bf16.msra.mxu1 %v1217_v11  ;;  %v251_v11 = vld [vmem:[#allocation10 + $0x138] sm:$0xff] }
 0x236   :  { %1220 = vmatprep.subr.bf16.mxu1 %v1219_v12  ;;  %v1249_v12 = vpack.c.bf16 %v233_v9, %v232_v7  ;;  %v1251_v13 = vpack.c.bf16 %v251_v11, %v250_v10  ;;  %v852_v7 = vld [vmem:[%s1638_s5 + $0x8] ss:$0 sm:$0xff] }
 0x237   :  { %1196 = vmatpush3.bf16.msra.mxu0 %v1195_v46  ;;  %v849_v46 = vld [vmem:[%s1638_s5 + $0x3] ss:$0 sm:$0xff] }
 0x238   :  { %1197 = vmatprep.subr.bf16.mxu0 %v1444_v37 }
 0x239   :  { %1222 = vmatpush1.bf16.msra.mxu1 %v1221_v17  ;;  %v253_v17 = vld [vmem:[#allocation10 + $0x158] sm:$0xff] }
 0x23a   :  { %1224 = vmatprep.subr.bf16.mxu1 %v1223_v18  ;;  %v1253_v18 = vpack.c.bf16 %v235_v15, %v234_v14 }
 0x23b   :  { %1199 = vmatpush3.bf16.msra.mxu0 %v1198_v49 }
 0x23c   :  { %1200 = vmatprep.subr.bf16.mxu0 %v1444_v37 }
 0x23f   :  { %1202 = vmatpush3.bf16.msra.mxu0 %v1201_v52 }
 0x240   :  { %1203 = vmatprep.subr.bf16.mxu0 %v1444_v37 }
 0x243   :  { %1205 = vmatpush3.bf16.msra.mxu0 %v1204_v57 }
 0x244   :  { %1206 = vmatprep.subr.bf16.mxu0 %v1444_v37 }
 0x247   :  { %1208 = vmatpush3.bf16.msra.mxu0 %v1207_v0 }
 0x248   :  { %1209 = vmatprep.subr.bf16.mxu0 %v1444_v37 }
 0x24b   :  { %1211 = vmatpush3.bf16.msra.mxu0 %v1210_v63  ;;  %v199_v63 = vld [vmem:[#allocation8 + $0x278] sm:$0xff] }
 0x24c   :  { %1212 = vmatprep.subr.bf16.mxu0 %v1444_v37  ;;  %v176_v37 = vld [vmem:[#allocation8 + $0xb8] sm:$0xff]  ;;  %v1243_v1 = vpack.c.bf16 %v199_v63, %v197_v62 }
 0x24d   :  { %v1225_v22 = vpack.c.bf16 %v178_v19, %v176_v37  ;;  %v1255_v37 = vpack.c.bf16 %v253_v17, %v252_v16  ;;  %v236_v19 = vld [vmem:[#allocation10 + $0x48] sm:$0xff] }
 0x24f   :  { %1214 = vmatpush3.bf16.msra.mxu0 %v1213_v3  ;;  %1226 = vmatpush1.bf16.msra.mxu1 %v1225_v22  ;;  %v198_v3 = vld [vmem:[#allocation8 + $0x270] sm:$0xff]  ;;  %v255_v22 = vld [vmem:[#allocation10 + $0x178] sm:$0xff] }
 0x250   :  { %1228 = vmatprep.subr.bf16.mxu1 %v1227_v23  ;;  %v1245_v4 = vpack.c.bf16 %v198_v3, %v196_v2  ;;  %1248 = vmatprep.subr.bf16.mxu0 %v1247_v8  ;;  %v1257_v23 = vpack.c.bf16 %v237_v20, %v236_v19  ;;  %v1259_v24 = vpack.c.bf16 %v255_v22, %v254_v21 }
 0x253   :  { %1230 = vmatpush1.bf16.msra.mxu1 %v1229_v28  ;;  %v257_v28 = vld [vmem:[#allocation10 + $0x198] sm:$0xff] }
 0x254   :  { %1232 = vmatprep.subr.bf16.mxu1 %v1231_v29  ;;  %v1261_v29 = vpack.c.bf16 %v239_v26, %v238_v25  ;;  %v1263_v30 = vpack.c.bf16 %v257_v28, %v256_v27 }
 0x257   :  { %1234 = vmatpush1.bf16.msra.mxu1 %v1233_v34  ;;  %v259_v34 = vld [vmem:[#allocation10 + $0x1b8] sm:$0xff] }
 0x258   :  { %1236 = vmatprep.subr.bf16.mxu1 %v1235_v35  ;;  %v1265_v35 = vpack.c.bf16 %v241_v32, %v240_v31  ;;  %v1267_v36 = vpack.c.bf16 %v259_v34, %v258_v33 }
 0x25b   :  { %1238 = vmatpush1.bf16.msra.mxu1 %v1237_v41  ;;  %v261_v41 = vld [vmem:[#allocation10 + $0x1d8] sm:$0xff] }
 0x25c   :  { %1240 = vmatprep.subr.bf16.mxu1 %v1239_v42  ;;  %v1269_v42 = vpack.c.bf16 %v243_v39, %v242_v38  ;;  %v1271_v43 = vpack.c.bf16 %v261_v41, %v260_v40 }
 0x25f   :  { %1242 = vmatpush1.bf16.msra.mxu1 %v1241_v45 }
 0x260   :  { %1244 = vmatprep.subr.bf16.mxu1 %v1243_v1 }
 0x263   :  { %1246 = vmatpush1.bf16.msra.mxu1 %v1245_v4 }
 0x305   :  { %v505_v48 = vpop.f32.mrb[2].mxu0  ;;  %v581_v49 = vpop.f32.mrb[2].mxu1 }
 0x306   :  { %v506_v50 = vadd.f32 %v849_v46, %v505_v48  ;;  %v582_v51 = vadd.f32 %v850_v47, %v581_v49  ;;  %v1008_v52 = vpop.f32.mrb[3].mxu0  ;;  %v1043_v53 = vpop.f32.mrb[3].mxu1  ;;  %v244_v49 = vld [vmem:[#allocation10 + $0xc8] sm:$0xff] }
 0x307   :  { %v262_v52 = vld [vmem:[#allocation10 + $0x1e8] sm:$0xff]  ;;  %v263_v53 = vld [vmem:[#allocation10 + $0x1f8] sm:$0xff] }
 0x308   :  { %829 = vst [vmem:[#allocation11 + $0x8] sm:$0xff] %v506_v50  ;;  %v586_v54 = vmul.f32 0.5, %v582_v51  ;;  %830 = vst [vmem:[#allocation11 + $0x10] sm:$0xff] %v582_v51 }
 0x30a   :  { %v587_v57 = vmul.f32 1.442695, %v586_v54  ;;  %v1275_v54 = vpack.c.bf16 %v263_v53, %v262_v52 }
 0x30c   :  { %1292 = vpow2.f32 %v587_v57  ;;  %v246_v57 = vld [vmem:[#allocation10 + $0xe8] sm:$0xff] }
 0x316   :  { %v1293_v60 = vpop.eup %1292 }
 0x317   :  { %v589_v0 = vmul.f32 %v1293_v60, %v585_v59  ;;  %v247_v59 = vld [vmem:[#allocation10 + $0xf8] sm:$0xff] }
 0x318   :  { %v1277_v60 = vpack.c.bf16 %v247_v59, %v246_v57 }
 0x319   :  { %v590_v61 = vadd.f32 %v589_v0, %v506_v50  ;;  %v245_v50 = vld [vmem:[#allocation10 + $0xd8] sm:$0xff]  ;;  %v269_v0 = vld [vmem:[%s1638_s5 + $0x6] sm:$0x3] }
 0x31a   :  { %v1273_v51 = vpack.c.bf16 %v245_v50, %v244_v49  ;;  %v676_v62 = vrot.slane %v269_v0, %v279_v58 }
 0x31b   :  { %1077 = vmatmul.mubr.f32.vlgmr.msra.gmra.mrb[4].mxu0 %v590_v61  ;;  %v672_v61 = vrot.slane %v269_v0, %v275_v56 }
 0x31c   :  { %1250 = vmatpush3.bf16.msra.mxu0 %v1249_v12 }
 0x31d   :  { %1252 = vmatprep.subr.bf16.mxu0 %v1251_v13 }
 0x320   :  { %1254 = vmatpush3.bf16.msra.mxu0 %v1253_v18 }
 0x321   :  { %1256 = vmatprep.subr.bf16.mxu0 %v1255_v37 }
 0x324   :  { %1258 = vmatpush3.bf16.msra.mxu0 %v1257_v23 }
 0x325   :  { %1260 = vmatprep.subr.bf16.mxu0 %v1259_v24 }
 0x328   :  { %1262 = vmatpush3.bf16.msra.mxu0 %v1261_v29 }
 0x329   :  { %1264 = vmatprep.subr.bf16.mxu0 %v1263_v30 }
 0x32c   :  { %1266 = vmatpush3.bf16.msra.mxu0 %v1265_v35 }
 0x32d   :  { %1268 = vmatprep.subr.bf16.mxu0 %v1267_v36 }
 0x330   :  { %1270 = vmatpush3.bf16.msra.mxu0 %v1269_v42 }
 0x331   :  { %1272 = vmatprep.subr.bf16.mxu0 %v1271_v43 }
 0x334   :  { %1274 = vmatpush3.bf16.msra.mxu0 %v1273_v51 }
 0x335   :  { %1276 = vmatprep.subr.bf16.mxu0 %v1275_v54 }
 0x338   :  { %1278 = vmatpush3.bf16.msra.mxu0 %v1277_v60 }
 0x3ee   :  { %v663_v45 = vpop.f32.mrb[4].mxu0 }
 0x3ef   :  { %v664_v46 = vadd.f32 %v851_v44, %v663_v45  ;;  %v1078_v47 = vpop.f32.mrb[5].mxu0 }
 0x3f1   :  { %v667_v48 = vmax.f32 %v664_v46, 0.0 }
 0x3f3   :  { %744 = vmatmul.mubr.f32.vlgmr.msra.gmra.mrb[4].mxu1 %v667_v48 }
 0x4c6   :  { %v745_v63 = vpop.f32.mrb[4].mxu1 }
 0x4c7   :  { %v746_v1 = vadd.f32 %v745_v63, %v672_v61  ;;  %v747_v2 = vpop.f32.mrb[5].mxu1 }
 0x4c8   :  { %v748_v3 = vadd.f32 %v747_v2, %v676_v62 }
 0x4c9   :  { %v750_v5 = vmax.f32 %v746_v1, 0.0 }
 0x4ca   :  { %v751_v4 = vmax.f32 %v748_v3, 0.0 }
 0x4cc   :  { %822 = vmatprep.mubr.f32.mxu0 %v751_v4 }
 0x4cd   :  { %823 = vmatmul.mubr.f32.vlgmr.msra.gmra.mrb[6].mxu0 %v750_v5 }
 0x5a0   :  { %v971_v6 = vpop.f32.mrb[6].mxu0 }
 0x5a1   :  { %v972_v8 = vpop.f32.mrb[7].mxu0 }
 0x5a2   :  { %v973_v56 = vadd.f32 %v972_v8, %v971_v6 }
 0x5a4   :  { %v825_v9 = vadd.f32 %v973_v56, %v852_v7 }
 0x5a6   :  { %828 = vst [vmem:[#allocation11] sm:$0xff] %v825_v9 }
 0x5a7   :  { %1415 = shalt.err (!%p1412_p2)
}
 0x5a8   :  { %s1416_s23 = scalar_lea.hbm %s1639_s6, 384 }
 0x5a9   :  { %p1417_p3 = scmp.ne.s32.totalorder %s1639_s6, %s1416_s23  ;;  %p1420_p4 = scmp.lt.u32.totalorder %s1416_s23, %s1639_s6 }
 0x5ab   :  { %p1422_p5 = pnand %p1420_p4, %p1417_p3 }
 0x5ad   :  { %1425 = shalt.err (!%p1422_p5)
}
 0x5ae   :  { %840 = dma.vmem_to_hbm [thread:$0]  %s838_s19, 384, %s1639_s6, [#allocation4]  }
 0x5af   :  { %1432 = dma.done.wait [#allocation4], 384  }
 0x5b0   :  { %1433 = vsyncadd [#allocation4], 4294966912 }
 0x5b1   :  { %844 = vsyncpa [#allocation3], 1 }
 0x5b2   :  { %845 = vsyncpa [#allocation6], 1 }
 0x5b3   :  { %846 = vsyncpa [#allocation9], 1 }
 0x5b4   :  { %847 = vsyncpa [#allocation4], 1 }

</bundles_post_ra>
